<compile_context>
chip_gen: v7x
topology: tpu7x:2x2x1
jax: 0.10.0
libtpu: 0.0.40
codegen_flags: <defaults>
</compile_context>

<pallas_src>
import functools

import jax
import jax.numpy as jnp
import numpy as np
from jax.experimental import pallas as pl
from jax.experimental.pallas import tpu as pltpu


# ---------------------------------------------------------------------------
# Kernels
# ---------------------------------------------------------------------------
def _ffn_kernel_inplace(x_ref, w1_ref, b1_ref, w2_ref, b2_ref, out_ref):
    """fp32 output: accumulate the second GEMM directly into out_ref.

    Grid = (row tiles [parallel], hidden tiles [arbitrary, reduction]).
    The output block's index_map ignores the hidden axis, so it stays
    resident in VMEM across the whole reduction (P3 accumulator pattern).
    """
    j = pl.program_id(1)

    @pl.when(j == 0)
    def _():
        out_ref[...] = jnp.zeros_like(out_ref)

    # First GEMM: (tm, Dp) x (Dp, th), bf16 operands, fp32 accumulation.
    hid = jnp.dot(x_ref[...], w1_ref[...], preferred_element_type=jnp.float32)
    hid = jnp.maximum(hid + b1_ref[...], 0.0)          # bias + ReLU in fp32

    # Second GEMM: this hidden chunk's contribution to the output tile.
    out_ref[...] += jnp.dot(hid.astype(jnp.bfloat16), w2_ref[...],
                            preferred_element_type=jnp.float32)

    @pl.when(j == pl.num_programs(1) - 1)
    def _():
        out_ref[...] += b2_ref[...]


def _ffn_kernel_scratch(x_ref, w1_ref, b1_ref, w2_ref, b2_ref, out_ref,
                        acc_ref):
    """Narrow (e.g. bf16) output: fp32 accumulation in a VMEM scratch."""
    j = pl.program_id(1)

    @pl.when(j == 0)
    def _():
        acc_ref[...] = jnp.zeros_like(acc_ref)

    hid = jnp.dot(x_ref[...], w1_ref[...], preferred_element_type=jnp.float32)
    hid = jnp.maximum(hid + b1_ref[...], 0.0)
    acc_ref[...] += jnp.dot(hid.astype(jnp.bfloat16), w2_ref[...],
                            preferred_element_type=jnp.float32)

    @pl.when(j == pl.num_programs(1) - 1)
    def _():
        out_ref[...] = (acc_ref[...] + b2_ref[...]).astype(out_ref.dtype)


# ---------------------------------------------------------------------------
# Wrapper helpers
# ---------------------------------------------------------------------------
def _round_up(a, m):
    return (a + m - 1) // m * m


def _pad_cast_2d(a, rows, cols, dtype):
    """Cast to `dtype`; only materialize a padded buffer if shapes differ."""
    a = a.astype(dtype)
    if a.shape == (rows, cols):
        return a
    return jnp.zeros((rows, cols), dtype).at[:a.shape[0], :a.shape[1]].set(a)


def _vmem_budget_bytes():
    """Generation-aware (budget, scoped-limit) in bytes.

    v5e/v6e have 128 MiB physical VMEM -> spend freely; anything else
    (including v7x, which only has 64 MiB per TensorCore) gets a
    conservative budget.
    """
    try:
        kind = jax.devices()[0].device_kind.lower()
    except Exception:  # pragma: no cover - planner fallback
        kind = ""
    if ("v5" in kind) or ("v6" in kind):
        return 80 * 1024 * 1024, 96 * 1024 * 1024
    return 44 * 1024 * 1024, 56 * 1024 * 1024


def _plan_tiles(M, d_pad, dh_pad0, d_out_pad, out_bytes, tm_max, th_max):
    """Pick (tm, th, vmem_limit) so the double-buffered working set fits."""
    budget, vmem_limit = _vmem_budget_bytes()

    m_rows = _round_up(M, 8)
    tm = min(tm_max, m_rows)
    # Megacore: guarantee >= 2 row tiles on the parallel axis when possible.
    if m_rows > 8 and _round_up(M, tm) // tm < 2:
        tm = max(8, _round_up(-(-M // 2), 8))
    th = min(th_max, dh_pad0)

    use_acc = out_bytes != 4

    def working_set(tm_, th_):
        return (tm_ * d_pad * 2 * 2                 # x tile, bf16, 2 buffers
                + d_pad * th_ * 2 * 2               # W1 tile, bf16
                + th_ * 4 * 2                       # b1 tile, fp32
                + th_ * d_out_pad * 2 * 2           # W2 tile, bf16
                + d_out_pad * 4 * 2                 # b2, fp32
                + tm_ * d_out_pad * out_bytes * 2   # out tile
                + (tm_ * d_out_pad * 4 if use_acc else 0))  # fp32 acc scratch

    # Shrink th first (weight HBM traffic is independent of th); then tm.
    while working_set(tm, th) > budget:
        if th > 256:
            th = max(256, th - 128)
        elif tm > 8:
            tm = max(8, _round_up(tm // 2, 8))
        else:
            break
    return tm, th, vmem_limit


# ---------------------------------------------------------------------------
# Public entry point
# ---------------------------------------------------------------------------
@functools.partial(jax.jit, static_argnames=("tm_max", "th_max"))
def ffn(x, W1, b1, W2, b2, *, tm_max=512, th_max=512):
    """Pallas FFN matching torch: relu(X @ W1 + b1) @ W2 + b2."""
    orig_shape = x.shape
    out_dtype = x.dtype
    d, dh = W1.shape
    d_out = W2.shape[1]

    M = int(np.prod(orig_shape[:-1]))

    # ---- lane/sublane-aligned padded shapes ----
    d_pad = _round_up(d, 128)
    d_out_pad = _round_up(d_out, 128)
    dh_pad0 = _round_up(dh, 128)

    out_bytes = jnp.dtype(out_dtype).itemsize
    tm, th, vmem_limit = _plan_tiles(M, d_pad, dh_pad0, d_out_pad,
                                     out_bytes, tm_max, th_max)
    m_pad = _round_up(M, tm)
    dh_pad = _round_up(dh_pad0, th)

    # Activations streamed as bf16 (MXU input dtype); fp32 copy buys nothing.
    xp = _pad_cast_2d(x.reshape(M, d), m_pad, d_pad, jnp.bfloat16)
    # Weights bf16 (halves DMA bytes / VMEM), biases fp32.  Padding is a
    # no-op when dims are already 128-aligned; for repeated calls pre-pad /
    # pre-cast these once outside the jit.
    w1p = _pad_cast_2d(W1, d_pad, dh_pad, jnp.bfloat16)
    b1p = _pad_cast_2d(b1.reshape(1, -1), 1, dh_pad, jnp.float32)
    w2p = _pad_cast_2d(W2, dh_pad, d_out_pad, jnp.bfloat16)
    b2p = _pad_cast_2d(b2.reshape(1, -1), 1, d_out_pad, jnp.float32)

    grid = (m_pad // tm, dh_pad // th)

    use_acc = out_bytes != 4
    kernel = _ffn_kernel_scratch if use_acc else _ffn_kernel_inplace
    scratch = ([pltpu.VMEM((tm, d_out_pad), jnp.float32)] if use_acc else [])

    # TODO(synk): for v7x with d_out_pad >= ~4096, add an output (N) grid
    # axis instead of holding full-width (tm, d_out_pad) out/W2 tiles.
    out_padded = pl.pallas_call(
        kernel,
        out_shape=jax.ShapeDtypeStruct((m_pad, d_out_pad), out_dtype),
        grid_spec=pltpu.PrefetchScalarGridSpec(
            num_scalar_prefetch=0,
            grid=grid,
            in_specs=[
                pl.BlockSpec((tm, d_pad), lambda i, j: (i, 0)),       # x
                pl.BlockSpec((d_pad, th), lambda i, j: (0, j)),       # W1
                pl.BlockSpec((1, th), lambda i, j: (0, j)),           # b1
                pl.BlockSpec((th, d_out_pad), lambda i, j: (j, 0)),   # W2
                pl.BlockSpec((1, d_out_pad), lambda i, j: (0, 0)),    # b2
            ],
            out_specs=pl.BlockSpec((tm, d_out_pad), lambda i, j: (i, 0)),
            scratch_shapes=scratch,
        ),
        compiler_params=pltpu.CompilerParams(
            dimension_semantics=("parallel", "arbitrary"),
            vmem_limit_bytes=vmem_limit),
    )(xp, w1p, b1p, w2p, b2p)

    out = out_padded[:M, :d_out]
    return out.reshape(orig_shape[:-1] + (d_out,))


def reference(x, W1, b1, W2, b2):
    hid = jax.nn.relu(x @ W1 + b1)
    return hid @ W2 + b2


if __name__ == "__main__":
    # Small shapes consistent with the module: X (B, S, D), d_hidden = 4*D.
    B, S, D = 2, 8, 32
    DH = 4 * D

    key = jax.random.PRNGKey(0)
    kx, k1, k2 = jax.random.split(key, 3)

    x = jax.random.normal(kx, (B, S, D), jnp.float32)
    W1 = jax.random.normal(k1, (D, DH), jnp.float32)
    b1 = jnp.zeros((DH,), jnp.float32)
    W2 = jax.random.normal(k2, (DH, D), jnp.float32)
    b2 = jnp.zeros((D,), jnp.float32)

    out = jax.block_until_ready(ffn(x, W1, b1, W2, b2))

    ref = jax.block_until_ready(reference(x, W1, b1, W2, b2))
    rel_err = float(jnp.max(jnp.abs(out - ref)) / (jnp.max(jnp.abs(ref)) + 1.0))
    assert out.shape == ref.shape, (out.shape, ref.shape)
    # bf16 MXU operands with fp32 accumulation: expect ~1e-3 relative error.
    assert rel_err < 2e-2, f"mismatch vs reference: rel max err {rel_err}"

    print("KERNEL_OK")
</pallas_src>

<mosaic_0001>
module attributes {stable_mosaic.version = 11 : i64} {
  func.func @_ffn_kernel_inplace(%arg0: i32, %arg1: i32, %arg2: memref<8x128xbf16, #tpu.memory_space<vmem>>, %arg3: memref<128x128xbf16, #tpu.memory_space<vmem>>, %arg4: memref<1x128xf32, #tpu.memory_space<vmem>>, %arg5: memref<128x128xbf16, #tpu.memory_space<vmem>>, %arg6: memref<1x128xf32, #tpu.memory_space<vmem>>, %arg7: memref<8x128xf32, #tpu.memory_space<vmem>>) attributes {dimension_semantics = [#tpu.dimension_semantics<parallel>, #tpu.dimension_semantics<arbitrary>], iteration_bounds = array<i64: 2, 1>, scalar_prefetch = 0 : i64, scratch_operands = 0 : i64, tpu.core_type = #tpu.core_type<tc>, window_params = [{transform_indices = @transform_0, window_bounds = array<i64: 8, 128>}, {transform_indices = @transform_1, window_bounds = array<i64: 128, 128>}, {transform_indices = @transform_2, window_bounds = array<i64: 1, 128>}, {transform_indices = @transform_3, window_bounds = array<i64: 128, 128>}, {pipeline_mode = #tpu.pipeline_mode<synchronous>, transform_indices = @transform_4, window_bounds = array<i64: 1, 128>}, {transform_indices = @transform_5, window_bounds = array<i64: 8, 128>}]} {
    %c0_i32 = arith.constant 0 : i32
    %0 = arith.cmpi eq, %arg1, %c0_i32 : i32
    %1 = arith.extui %0 : i1 to i32
    %c0_i32_0 = arith.constant 0 : i32
    %2 = arith.cmpi ne, %1, %c0_i32_0 : i32
    scf.if %2 {
      %cst_16 = arith.constant 0.000000e+00 : f32
      %20 = vector.broadcast %cst_16 : f32 to vector<8x128xf32>
      %c0_17 = arith.constant 0 : index
      %c0_18 = arith.constant 0 : index
      %21 = vector.load %arg7[%c0_17, %c0_18] : memref<8x128xf32, #tpu.memory_space<vmem>>, vector<8x128xf32>
      tpu.vector_store %arg7[%c0_17, %c0_18], %20 {strides = array<i32>} : memref<8x128xf32, #tpu.memory_space<vmem>>, vector<8x128xf32>,
    } else {
    }
    %c0 = arith.constant 0 : index
    %c0_1 = arith.constant 0 : index
    %3 = vector.load %arg2[%c0, %c0_1] : memref<8x128xbf16, #tpu.memory_space<vmem>>, vector<8x128xbf16>
    %c0_2 = arith.constant 0 : index
    %c0_3 = arith.constant 0 : index
    %4 = vector.load %arg3[%c0_2, %c0_3] : memref<128x128xbf16, #tpu.memory_space<vmem>>, vector<128x128xbf16>
    %cst = arith.constant dense<0.000000e+00> : vector<8x128xf32>
    %5 = tpu.matmul %3, %4, %cst {dimension_numbers = #tpu.dot_dimension_numbers<[1], [0], [0], [1], [0, 0, 1, 1], [], []>} : vector<8x128xbf16>, vector<128x128xbf16>, vector<8x128xf32> -> vector<8x128xf32>
    %c0_4 = arith.constant 0 : index
    %c0_5 = arith.constant 0 : index
    %6 = vector.load %arg4[%c0_4, %c0_5] : memref<1x128xf32, #tpu.memory_space<vmem>>, vector<1x128xf32>
    %7 = vector.broadcast %6 : vector<1x128xf32> to vector<8x128xf32>
    %8 = arith.addf %5, %7 : vector<8x128xf32>
    %cst_6 = arith.constant 0.000000e+00 : f32
    %9 = vector.broadcast %cst_6 : f32 to vector<8x128xf32>
    %10 = arith.maximumf %8, %9 : vector<8x128xf32>
    %c0_7 = arith.constant 0 : index
    %c0_8 = arith.constant 0 : index
    %11 = vector.load %arg7[%c0_7, %c0_8] : memref<8x128xf32, #tpu.memory_space<vmem>>, vector<8x128xf32>
    %12 = arith.truncf %10 : vector<8x128xf32> to vector<8x128xbf16>
    %c0_9 = arith.constant 0 : index
    %c0_10 = arith.constant 0 : index
    %13 = vector.load %arg5[%c0_9, %c0_10] : memref<128x128xbf16, #tpu.memory_space<vmem>>, vector<128x128xbf16>
    %cst_11 = arith.constant dense<0.000000e+00> : vector<8x128xf32>
    %14 = tpu.matmul %12, %13, %cst_11 {dimension_numbers = #tpu.dot_dimension_numbers<[1], [0], [0], [1], [0, 0, 1, 1], [], []>} : vector<8x128xbf16>, vector<128x128xbf16>, vector<8x128xf32> -> vector<8x128xf32>
    %15 = arith.addf %11, %14 : vector<8x128xf32>
    %c0_12 = arith.constant 0 : index
    %c0_13 = arith.constant 0 : index
    %16 = vector.load %arg7[%c0_12, %c0_13] : memref<8x128xf32, #tpu.memory_space<vmem>>, vector<8x128xf32>
    tpu.vector_store %arg7[%c0_12, %c0_13], %15 {strides = array<i32>} : memref<8x128xf32, #tpu.memory_space<vmem>>, vector<8x128xf32>,
    %c0_i32_14 = arith.constant 0 : i32
    %17 = arith.cmpi eq, %arg1, %c0_i32_14 : i32
    %18 = arith.extui %17 : i1 to i32
    %c0_i32_15 = arith.constant 0 : i32
    %19 = arith.cmpi ne, %18, %c0_i32_15 : i32
    scf.if %19 {
      %c0_16 = arith.constant 0 : index
      %c0_17 = arith.constant 0 : index
      %20 = vector.load %arg7[%c0_16, %c0_17] : memref<8x128xf32, #tpu.memory_space<vmem>>, vector<8x128xf32>
      %c0_18 = arith.constant 0 : index
      %c0_19 = arith.constant 0 : index
      %21 = vector.load %arg6[%c0_18, %c0_19] : memref<1x128xf32, #tpu.memory_space<vmem>>, vector<1x128xf32>
      %22 = vector.broadcast %21 : vector<1x128xf32> to vector<8x128xf32>
      %23 = arith.addf %20, %22 : vector<8x128xf32>
      %c0_20 = arith.constant 0 : index
      %c0_21 = arith.constant 0 : index
      %24 = vector.load %arg7[%c0_20, %c0_21] : memref<8x128xf32, #tpu.memory_space<vmem>>, vector<8x128xf32>
      tpu.vector_store %arg7[%c0_20, %c0_21], %23 {strides = array<i32>} : memref<8x128xf32, #tpu.memory_space<vmem>>, vector<8x128xf32>,
    } else {
    }
    return
  }
  func.func @transform_0(%arg0: i32, %arg1: i32) -> (i32, i32) {
    %c0_i32 = arith.constant 0 : i32
    %c0_i32_0 = arith.constant 0 : i32
    return %arg0, %c0_i32 : i32, i32
  }
  func.func @transform_1(%arg0: i32, %arg1: i32) -> (i32, i32) {
    %c0_i32 = arith.constant 0 : i32
    %c0_i32_0 = arith.constant 0 : i32
    return %c0_i32, %arg1 : i32, i32
  }
  func.func @transform_2(%arg0: i32, %arg1: i32) -> (i32, i32) {
    %c0_i32 = arith.constant 0 : i32
    %c0_i32_0 = arith.constant 0 : i32
    return %c0_i32, %arg1 : i32, i32
  }
  func.func @transform_3(%arg0: i32, %arg1: i32) -> (i32, i32) {
    %c0_i32 = arith.constant 0 : i32
    %c0_i32_0 = arith.constant 0 : i32
    return %arg1, %c0_i32 : i32, i32
  }
  func.func @transform_4(%arg0: i32, %arg1: i32) -> (i32, i32) {
    %c0_i32 = arith.constant 0 : i32
    %c0_i32_0 = arith.constant 0 : i32
    %c0_i32_1 = arith.constant 0 : i32
    return %c0_i32, %c0_i32_0 : i32, i32
  }
  func.func @transform_5(%arg0: i32, %arg1: i32) -> (i32, i32) {
    %c0_i32 = arith.constant 0 : i32
    %c0_i32_0 = arith.constant 0 : i32
    return %arg0, %c0_i32 : i32, i32
  }
}

</mosaic_0001>

<bundles_post_ra>
// kernel: ffn.1
= control target key start
LH: loop header
LB: loop body
LE: loop exit
PB: predicated region body
PF: predicated region fallthrough
CT: control target
= control target key end

     0   :  { %s815_s18 = smov 0   ;;  %s817_s19 = smov 0   ;;  %s910_s0 = inlined_call_operand.vmem [shape: bf16[16,128], index: 0, kind: input, shape index: {}]   ;;  %s911_s1 = inlined_call_operand.vmem [shape: bf16[128,128], index: 1, kind: input, shape index: {}]   ;;  %s912_s2 = inlined_call_operand.vmem [shape: f32[1,128], index: 2, kind: input, shape index: {}]   ;;  %s913_s3 = inlined_call_operand.vmem [shape: bf16[128,128], index: 3, kind: input, shape index: {}]   ;;  %s914_s4 = inlined_call_operand.vmem [shape: f32[1,128], index: 4, kind: input, shape index: {}]   ;;  %s915_s5 = inlined_call_operand.vmem [shape: f32[16,128], index: 5, kind: output, shape index: {}]  }
   0x1   :  { %s819_s20 = smov 0  }
   0x2 LB: > { %s27_s21 = sadd.s32 1, %s777_s19  ;;  %p636_p0 = scmp.ge.s32.totalorder %s781_s20, 1  ;;  %s781_s20 = sphi %s819_s20, %s15_s20   ;;  %s777_s19 = sphi %s817_s19, %s917_s19   ;;  %s773_s18 = sphi %s815_s18, %s916_s18  }
   0x3   : > { %p29_p1 = scmp.ge.s32.totalorder %s27_s21, 2  ;;  %p226_p2 = scmp.lt.s32.totalorder %s781_s20, 3 }
   0x5   : > { %s919_s21 = smov (%p29_p1, %s27_s21), 0  ;;  %p227_p3 = pnand %p636_p0, %p226_p2 }
   0x6   : > { %v743_v0 = vld [vmem:[%s911_s1] sm:$0xff] (!%p227_p3)   ;;  %v783_v1 = vmov (!%p227_p3), 0.0   ;;  %v744_v2 = vld [vmem:[%s911_s1 + $0x8] sm:$0xff] (!%p227_p3)   ;;  %vm784_vm0 = vmmov (!%p227_p3), 0   ;;  %v745_v3 = vld [vmem:[%s911_s1 + $0x10] sm:$0xff] (!%p227_p3)   ;;  %p264_p4 = scmp.lt.s32.totalorder (!%p227_p3), %s773_s18, 1 }
   0x7   : > { %230 = sbr.rel (%p227_p3) target bundleno = 472 (0x1d8), region = 40  ;;  %677 = vmatprep.subr.bf16.mxu0 (!%p227_p3), %v783_v1  ;;  %697 = vmatprep.subr.bf16.mxu1 (!%p227_p3), %v783_v1  ;;  %v751_v4 = vld [vmem:[%s913_s3] sm:$0xff] (!%p227_p3)   ;;  %v746_v5 = vld [vmem:[%s911_s1 + $0x18] sm:$0xff] (!%p227_p3)   ;;  %v752_v6 = vld [vmem:[%s913_s3 + $0x8] sm:$0xff] (!%p227_p3)  }
   0x8   : > { %678 = vmatpush3.bf16.msra.mxu0 (!%p227_p3), %v743_v0  ;;  %693 = vmatprep.mubr.msk.bf16.mxu0 (!%p227_p3), %vm784_vm0, %v783_v1  ;;  %v747_v7 = vld [vmem:[%s911_s1 + $0x20] sm:$0xff] (!%p227_p3)   ;;  %v753_v8 = vld [vmem:[%s913_s3 + $0x10] sm:$0xff] (!%p227_p3)   ;;  %v748_v9 = vld [vmem:[%s911_s1 + $0x28] sm:$0xff] (!%p227_p3)  }
   0x9   : > { %679 = vmatprep.subr.bf16.mxu0 (!%p227_p3), %v783_v1  ;;  %713 = vmatprep.mubr.msk.bf16.mxu1 (!%p227_p3), %vm784_vm0, %v783_v1  ;;  %v754_v10 = vld [vmem:[%s913_s3 + $0x18] sm:$0xff] (!%p227_p3)   ;;  %v749_v11 = vld [vmem:[%s911_s1 + $0x30] sm:$0xff] (!%p227_p3)   ;;  %v755_v12 = vld [vmem:[%s913_s3 + $0x20] sm:$0xff] (!%p227_p3)  }
   0xa   : > { %698 = vmatpush3.bf16.msra.mxu1 (!%p227_p3), %v751_v4  ;;  %v750_v13 = vld [vmem:[%s911_s1 + $0x38] sm:$0xff] (!%p227_p3)   ;;  %v756_v14 = vld [vmem:[%s913_s3 + $0x28] sm:$0xff] (!%p227_p3)   ;;  %v757_v16 = vld [vmem:[%s913_s3 + $0x30] sm:$0xff] (!%p227_p3)  }
   0xb   : > { %699 = vmatprep.subr.bf16.mxu1 (!%p227_p3), %v783_v1  ;;  %v758_v17 = vld [vmem:[%s913_s3 + $0x38] sm:$0xff] (!%p227_p3)   ;;  %v639_v18 = vld [vmem:[%s912_s2] ss:$0 sm:$0xff] (!%p227_p3) }
   0xc   : > { %680 = vmatpush3.bf16.msra.mxu0 (!%p227_p3), %v744_v2  ;;  %v656_v27 = vld [vmem:[%s914_s4] ss:$0 sm:$0xff] (!%p227_p3) }
   0xd   : > { %681 = vmatprep.subr.bf16.mxu0 (!%p227_p3), %v783_v1 }
   0xe   : > { %700 = vmatpush3.bf16.msra.mxu1 %v752_v6  ;;  %s921_s18 = smov (!%p264_p4, %s773_s18), 1 }
   0xf   : > { %701 = vmatprep.subr.bf16.mxu1 %v783_v1  ;;  %s637_s25 = sshll.u32 %s921_s18, 2  ;;  %s638_s14 = sshll.u32 %s921_s18, 3 }
  0x10   : > { %682 = vmatpush3.bf16.msra.mxu0 %v745_v3  ;;  %s267_s30 = scalar_lea.vmem %s910_s0, %s637_s25  ;;  %s284_s23 = scalar_lea.vmem %s915_s5, %s638_s14 }
  0x11   : > { %683 = vmatprep.subr.bf16.mxu0 %v783_v1  ;;  %v291_v15 = vld [vmem:[%s267_s30] sm:$0xf] }
  0x12   : > { %702 = vmatpush3.bf16.msra.mxu1 %v753_v8 }
  0x13   : > { %703 = vmatprep.subr.bf16.mxu1 %v783_v1 }
  0x14   : > { %684 = vmatpush3.bf16.msra.mxu0 %v746_v5 }
  0x15   : > { %685 = vmatprep.subr.bf16.mxu0 %v783_v1 }
  0x16   : > { %704 = vmatpush3.bf16.msra.mxu1 %v754_v10 }
  0x17   : > { %705 = vmatprep.subr.bf16.mxu1 %v783_v1 }
  0x18   : > { %686 = vmatpush3.bf16.msra.mxu0 %v747_v7 }
  0x19   : > { %687 = vmatprep.subr.bf16.mxu0 %v783_v1 }
  0x1a   : > { %706 = vmatpush3.bf16.msra.mxu1 %v755_v12 }
  0x1b   : > { %707 = vmatprep.subr.bf16.mxu1 %v783_v1 }
  0x1c   : > { %688 = vmatpush3.bf16.msra.mxu0 %v748_v9 }
  0x1d   : > { %689 = vmatprep.subr.bf16.mxu0 %v783_v1 }
  0x1e   : > { %708 = vmatpush3.bf16.msra.mxu1 %v756_v14 }
  0x1f   : > { %709 = vmatprep.subr.bf16.mxu1 %v783_v1 }
  0x20   : > { %690 = vmatpush3.bf16.msra.mxu0 %v749_v11 }
  0x21   : > { %691 = vmatprep.subr.bf16.mxu0 %v783_v1 }
  0x22   : > { %710 = vmatpush3.bf16.msra.mxu1 %v757_v16 }
  0x23   : > { %711 = vmatprep.subr.bf16.mxu1 %v783_v1 }
  0x24   : > { %692 = vmatpush3.bf16.msra.mxu0 %v750_v13 }
  0x26   : > { %712 = vmatpush3.bf16.msra.mxu1 %v758_v17 }
  0x27   : > { %694 = vmatmul.mubr.bf16.vlgmr.msra.gmra.mrb[0].mxu0 %v291_v15 }
  0xfa   : > { %v397_v19 = vpop.f32.mrb[0].mxu0 }
  0xfb   : > { %v398_v20 = vadd.f32 %v639_v18, %v397_v19  ;;  %v695_v21 = vpop.f32.mrb[1].mxu0 }
  0xfc   : > { %v400_v22 = vpop.f32.mrb[2].mxu0 }
  0xfd   : > { %v403_v23 = vmax.f32 %v398_v20, 0.0  ;;  %v696_v24 = vpop.f32.mrb[3].mxu0 }
  0xff   : > { %v405_v25 = vpack.c.bf16 %v403_v23, %v403_v23 }
 0x101   : > { %714 = vmatmul.mubr.bf16.vlgmr.msra.gmra.mrb[0].mxu1 %v405_v25 }
 0x1d4   : > { %v504_v26 = vpop.f32.mrb[0].mxu1 }
 0x1d5   : > { %v715_v28 = vpop.f32.mrb[1].mxu1  ;;  %v523_v30 = vadd.f32 %v656_v27, %v504_v26 }
 0x1d6   : > { %v507_v29 = vpop.f32.mrb[2].mxu1 }
 0x1d7   : > { %v716_v31 = vpop.f32.mrb[3].mxu1  ;;  %524 = vst [vmem:[%s284_s23] sm:$0xff] %v523_v30 }
 0x1d8 PF: > { %s15_s20 = sadd.s32 1, %s781_s20   ;;  %s916_s18 = smov %s777_s19 }
 0x1d9   : > { %p12_p5 = scmp.ge.s32.totalorder %s15_s20, 4   ;;  %s917_s19 = smov %s919_s21 }
 0x1db   :  { %14 = sbr.rel (!%p12_p5) target bundleno = 2 (0x2), region = 87 }

</bundles_post_ra>
